<compile_context>
chip_gen: v7x
topology: tpu7x:2x2x1
jax: 0.10.0
libtpu: 0.0.40
codegen_flags: <defaults>
</compile_context>

<pallas_src>
import functools

import jax
import jax.numpy as jnp
from jax.experimental import pallas as pl
from jax.experimental.pallas import tpu as pltpu

_LANE = 1024        # lane-dense last dim (multiple of 128), independent of H*W
_BLOCK_ROWS = 512   # sublane rows per tile -> (512, 1024) f32 = 2 MiB per tile


def _quantized_relu_kernel(alpha_ref, x_ref, o_ref, *, bit):
    # alpha_ref: SMEM scalar (1,); x_ref / o_ref: VMEM tiles (tr, _LANE).
    alpha = alpha_ref[0]
    levels = jnp.float32((1 << bit) - 1)        # 2**bit - 1 quantization steps
    scale = levels / alpha                      # one scalar divide per tile
    inv_scale = alpha / levels
    y = jnp.clip(x_ref[...], 0.0, alpha)        # torch.clamp(input_x, 0, alpha)
    o_ref[...] = jnp.round(y * scale) * inv_scale   # uniform quantize on [0, alpha]


def _call_kernel(x2, alpha_arr, bit, *, alias_input):
    """Run the tiled elementwise kernel over a (rows, _LANE) f32 array."""
    rows = x2.shape[0]
    # Block rows: 512 for large inputs; otherwise take the full (possibly
    # non-multiple-of-8) row extent, which is legal because the block dim then
    # equals the full array dim.
    tr = _BLOCK_ROWS if rows >= _BLOCK_ROWS else rows
    grid = (pl.cdiv(rows, tr),)   # ragged last block handled (masked) by Pallas

    kwargs = {}
    if alias_input:
        # Only safe/beneficial when x2 is a freshly materialized temp
        # (pad path inside the jitted wrapper).
        kwargs["input_output_aliases"] = {1: 0}

    return pl.pallas_call(
        functools.partial(_quantized_relu_kernel, bit=bit),
        out_shape=jax.ShapeDtypeStruct((rows, _LANE), x2.dtype),
        grid=grid,
        in_specs=[
            pl.BlockSpec(memory_space=pltpu.MemorySpace.SMEM),   # alpha scalar
            pl.BlockSpec((tr, _LANE), lambda i: (i, 0)),         # streamed tiles
        ],
        out_specs=pl.BlockSpec((tr, _LANE), lambda i: (i, 0)),
        compiler_params=pltpu.CompilerParams(
            dimension_semantics=("parallel",)),
        **kwargs,
    )(alpha_arr, x2)


@functools.partial(jax.jit, static_argnums=(2,))
def quantized_relu(x_nchw, alpha, bit):
    """x_nchw: float32 [N, C, H, W]; alpha: scalar float32; bit: python int."""
    orig_shape = x_nchw.shape
    total = x_nchw.size
    alpha_arr = jnp.asarray(alpha, jnp.float32).reshape((1,))

    if total % _LANE == 0:
        # Fast path: no pad, no output slice, no alias. 1 HBM read + 1 write.
        rows = total // _LANE
        x2 = x_nchw.reshape(rows, _LANE)
        out2 = _call_kernel(x2, alpha_arr, bit, alias_input=False)
        return out2.reshape(orig_shape)

    # Misaligned fallback: pad the flat tensor to the next _LANE multiple.
    # Zeros are a fixed point of the op, so padding never pollutes real
    # outputs.  The padded temp is fresh, so aliasing it with the output is
    # safe and lets XLA reuse the buffer.
    rows = -(-total // _LANE)
    padded = rows * _LANE
    flat = jnp.pad(x_nchw.reshape(-1), (0, padded - total))
    x2 = flat.reshape(rows, _LANE)
    out2 = _call_kernel(x2, alpha_arr, bit, alias_input=True)
    return out2.reshape(-1)[:total].reshape(orig_shape)


def _reference(x, alpha, bit):
    levels = jnp.float32((1 << bit) - 1)
    scale = levels / alpha
    inv_scale = alpha / levels
    y = jnp.clip(x, 0.0, alpha)
    return jnp.round(y * scale) * inv_scale


if __name__ == "__main__":
    key = jax.random.PRNGKey(0)

    # Module __init__: alpha = nn.Parameter(torch.tensor(1.0)), bit at ctor.
    alpha = jnp.float32(1.0)
    bit = 4

    # 1) Primary small NCHW case (fast path, single block: 2048 elems = 2 rows).
    x_small = jax.random.normal(key, (2, 4, 16, 16), dtype=jnp.float32)
    out_small = jax.block_until_ready(quantized_relu(x_small, alpha, bit))
    ref_small = _reference(x_small, alpha, bit)
    assert out_small.shape == x_small.shape and out_small.dtype == x_small.dtype
    assert jnp.allclose(out_small, ref_small, atol=1e-6), "mismatch (small)"

    # 2) Larger aligned case exercising the multi-block grid WITH a ragged last
    #    block: 6*32*64*64 = 786432 elems = 768 rows -> grid=2, last block 256
    #    real rows (masked stores).
    x_big = jax.random.normal(jax.random.PRNGKey(1), (6, 32, 64, 64),
                              dtype=jnp.float32)
    out_big = jax.block_until_ready(quantized_relu(x_big, alpha, bit))
    ref_big = _reference(x_big, alpha, bit)
    assert out_big.shape == x_big.shape and out_big.dtype == x_big.dtype
    assert jnp.allclose(out_big, ref_big, atol=1e-6), "mismatch (tiled/ragged)"

    # 3) Misaligned case exercising the pad fallback path (210 elements).
    x_odd = jax.random.normal(jax.random.PRNGKey(2), (2, 3, 5, 7),
                              dtype=jnp.float32)
    out_odd = jax.block_until_ready(quantized_relu(x_odd, alpha, bit))
    ref_odd = _reference(x_odd, alpha, bit)
    assert out_odd.shape == x_odd.shape and out_odd.dtype == x_odd.dtype
    assert jnp.allclose(out_odd, ref_odd, atol=1e-6), "mismatch (pad path)"

    print("KERNEL_OK")
</pallas_src>

<mosaic_0001>
module attributes {stable_mosaic.version = 11 : i64} {
  func.func @_quantized_relu_kernel(%arg0: i32, %arg1: memref<1xf32, #tpu.memory_space<smem>>, %arg2: memref<2x1024xf32, #tpu.memory_space<vmem>>, %arg3: memref<2x1024xf32, #tpu.memory_space<vmem>>) attributes {dimension_semantics = [#tpu.dimension_semantics<parallel>], iteration_bounds = array<i64: 1>, scalar_prefetch = 0 : i64, scratch_operands = 0 : i64, tpu.core_type = #tpu.core_type<tc>, window_params = [{transform_indices = @transform_0, window_bounds = array<i64: 1>}, {transform_indices = @transform_1, window_bounds = array<i64: 2, 1024>}, {transform_indices = @transform_2, window_bounds = array<i64: 2, 1024>}]} {
    %c0 = arith.constant 0 : index
    %0 = memref.load %arg1[%c0] : memref<1xf32, #tpu.memory_space<smem>>
    %cst = arith.constant 1.500000e+01 : f32
    %1 = arith.divf %cst, %0 : f32
    %cst_0 = arith.constant 1.500000e+01 : f32
    %2 = arith.divf %0, %cst_0 : f32
    %c0_1 = arith.constant 0 : index
    %c0_2 = arith.constant 0 : index
    %3 = vector.load %arg2[%c0_1, %c0_2] : memref<2x1024xf32, #tpu.memory_space<vmem>>, vector<2x1024xf32>
    %cst_3 = arith.constant 0.000000e+00 : f32
    %4 = vector.broadcast %cst_3 : f32 to vector<2x1024xf32>
    %5 = arith.maximumf %4, %3 : vector<2x1024xf32>
    %6 = vector.broadcast %0 : f32 to vector<2x1024xf32>
    %7 = arith.minimumf %6, %5 : vector<2x1024xf32>
    %8 = vector.broadcast %1 : f32 to vector<2x1024xf32>
    %9 = arith.mulf %7, %8 : vector<2x1024xf32>
    %10 = math.roundeven %9 : vector<2x1024xf32>
    %11 = vector.broadcast %2 : f32 to vector<2x1024xf32>
    %12 = arith.mulf %10, %11 : vector<2x1024xf32>
    %c0_4 = arith.constant 0 : index
    %c0_5 = arith.constant 0 : index
    %13 = vector.load %arg3[%c0_4, %c0_5] : memref<2x1024xf32, #tpu.memory_space<vmem>>, vector<2x1024xf32>
    tpu.vector_store %arg3[%c0_4, %c0_5], %12 {strides = array<i32>} : memref<2x1024xf32, #tpu.memory_space<vmem>>, vector<2x1024xf32>,
    return
  }
  func.func @transform_0(%arg0: i32) -> i32 {
    %c0_i32 = arith.constant 0 : i32
    %c0_i32_0 = arith.constant 0 : i32
    return %c0_i32 : i32
  }
  func.func @transform_1(%arg0: i32) -> (i32, i32) {
    %c0_i32 = arith.constant 0 : i32
    %c0_i32_0 = arith.constant 0 : i32
    return %arg0, %c0_i32 : i32, i32
  }
  func.func @transform_2(%arg0: i32) -> (i32, i32) {
    %c0_i32 = arith.constant 0 : i32
    %c0_i32_0 = arith.constant 0 : i32
    return %arg0, %c0_i32 : i32, i32
  }
}

</mosaic_0001>

<bundles_post_ra>
// kernel: quantized_relu.1
= control target key start
LH: loop header
LB: loop body
LE: loop exit
PB: predicated region body
PF: predicated region fallthrough
CT: control target
= control target key end

     0   :  { %s80_s0 = inlined_call_operand.<no memory space> [shape: f32[1], index: 0, kind: input, shape index: {}]   ;;  %s81_s1 = inlined_call_operand.vmem [shape: f32[2,1024], index: 1, kind: input, shape index: {}]   ;;  %s82_s2 = inlined_call_operand.vmem [shape: f32[2,1024], index: 2, kind: output, shape index: {}]  }
   0x1   :  { %v13_v0 = vstv %s80_s0  ;;  %v20_v2 = vld [vmem:[%s81_s1] sm:$0xff]  ;;  %v21_v3 = vld [vmem:[%s81_s1 + $0x8] sm:$0xff]  ;;  %s19_s18 = smul.f32 0.06666667, %s80_s0 }
   0x2   :  { %45 = vrcp.f32 %v13_v0  ;;  %v22_v4 = vmax.f32 %v20_v2, 0.0  ;;  %v23_v5 = vmax.f32 %v21_v3, 0.0 }
   0x3   :  { %v32_v11 = vstv %s19_s18 }
   0x4   :  { %v25_v6 = vmin.f32 %v13_v0, %v22_v4  ;;  %v26_v7 = vmin.f32 %v13_v0, %v23_v5 }
   0xc   :  { %v46_v1 = vpop.eup %45 }
   0xd   :  { %41 = vpush %v46_v1 }
  0x3e   :  { %s42_s15 = spop %41 }
  0x3f   :  { %s16_s19 = smul.f32 15.0, %s42_s15 }
  0x41   :  { %v27_v8 = vstv %s16_s19 }
  0x42   :  { %v28_v9 = vmul.f32 %v27_v8, %v25_v6  ;;  %v29_v10 = vmul.f32 %v27_v8, %v26_v7 }
  0x44   :  { %v43_v12 = vround.rtne.f32 %v28_v9  ;;  %v44_v13 = vround.rtne.f32 %v29_v10 }
  0x46   :  { %v33_v14 = vmul.f32 %v43_v12, %v32_v11  ;;  %v34_v15 = vmul.f32 %v44_v13, %v32_v11 }
  0x48   :  { %35 = vst [vmem:[%s82_s2] sm:$0xff] %v33_v14  ;;  %36 = vst [vmem:[%s82_s2 + $0x8] sm:$0xff] %v34_v15 }

</bundles_post_ra>
